<compile_context>
chip_gen: v7x
topology: tpu7x:2x2x1
jax: 0.10.0
libtpu: 0.0.40
codegen_flags: <defaults>
</compile_context>

<pallas_src>
import functools

import jax
import jax.numpy as jnp
from jax.experimental import pallas as pl
from jax.experimental.pallas import tpu as pltpu

EPS = 1e-5
NEG_INF = -1e9


def _pick_tile(dim, target, align):
    """Largest multiple of `align` that divides `dim` and is <= target; else full dim."""
    if dim <= target:
        return dim
    t = (target // align) * align
    while t >= align:
        if dim % t == 0:
            return t
        t -= align
    return dim


# ----------------------------- Pallas kernels -----------------------------

def _linear_kernel(x_ref, w_ref, b_ref, *rest, activation, has_residual):
    if has_residual:
        r_ref, o_ref, acc_ref = rest
    else:
        o_ref, acc_ref = rest

    k = pl.program_id(2)

    @pl.when(k == 0)
    def _():
        acc_ref[...] = jnp.zeros_like(acc_ref)

    acc_ref[...] += jnp.dot(x_ref[...], w_ref[...],
                            preferred_element_type=jnp.float32)

    @pl.when(k == pl.num_programs(2) - 1)
    def _():
        y = acc_ref[...] + b_ref[...]
        if activation == "gelu":
            # tanh-approx GELU (GPT2 style), computed in f32.
            y = 0.5 * y * (1.0 + jnp.tanh(
                0.7978845608028654 * (y + 0.044715 * y * y * y)))
        if has_residual:
            y = y + r_ref[...].astype(jnp.float32)
        o_ref[...] = y.astype(o_ref.dtype)


def linear(x2d, w, b, activation=None, residual=None):
    """y = act(x @ w + b) [+ residual]; bf16 MXU inputs / bf16 output, f32 accumulate."""
    M, K = x2d.shape
    N = w.shape[1]
    tm = _pick_tile(M, 512, 16)
    tn = _pick_tile(N, 512, 128)
    tk = _pick_tile(K, 512, 128)

    x2d = x2d.astype(jnp.bfloat16)
    w = w.astype(jnp.bfloat16)
    b2d = b.reshape(1, N).astype(jnp.float32)

    in_specs = [
        pl.BlockSpec((tm, tk), lambda i, j, k: (i, k)),
        pl.BlockSpec((tk, tn), lambda i, j, k: (k, j)),
        pl.BlockSpec((1, tn), lambda i, j, k: (0, j)),
    ]
    args = [x2d, w, b2d]
    if residual is not None:
        in_specs.append(pl.BlockSpec((tm, tn), lambda i, j, k: (i, j)))
        args.append(residual.astype(jnp.bfloat16))

    kernel = functools.partial(_linear_kernel, activation=activation,
                               has_residual=residual is not None)
    return pl.pallas_call(
        kernel,
        out_shape=jax.ShapeDtypeStruct((M, N), jnp.bfloat16),
        grid=(M // tm, N // tn, K // tk),
        in_specs=in_specs,
        out_specs=pl.BlockSpec((tm, tn), lambda i, j, k: (i, j)),
        scratch_shapes=[pltpu.VMEM((tm, tn), jnp.float32)],
        compiler_params=pltpu.CompilerParams(
            dimension_semantics=("parallel", "parallel", "arbitrary")),
    )(*args)


def _ln_kernel(x_ref, g_ref, b_ref, o_ref):
    x = x_ref[...].astype(jnp.float32)
    mu = jnp.mean(x, axis=-1, keepdims=True)
    var = jnp.mean(jnp.square(x - mu), axis=-1, keepdims=True)
    y = (x - mu) * jax.lax.rsqrt(var + EPS) * g_ref[...] + b_ref[...]
    o_ref[...] = y.astype(o_ref.dtype)


def layernorm(x, g, b, out_dtype=jnp.bfloat16):
    """bf16 in/out (configurable out dtype), f32 statistics in-kernel."""
    B, S, D = x.shape
    M = B * S
    x2d = x.reshape(M, D).astype(jnp.bfloat16)
    tm = _pick_tile(M, 512, 16)
    out = pl.pallas_call(
        _ln_kernel,
        out_shape=jax.ShapeDtypeStruct((M, D), out_dtype),
        grid=(M // tm,),
        in_specs=[
            pl.BlockSpec((tm, D), lambda i: (i, 0)),
            pl.BlockSpec((1, D), lambda i: (0, 0)),
            pl.BlockSpec((1, D), lambda i: (0, 0)),
        ],
        out_specs=pl.BlockSpec((tm, D), lambda i: (i, 0)),
        compiler_params=pltpu.CompilerParams(
            dimension_semantics=("parallel",)),
    )(x2d, g.reshape(1, D).astype(jnp.float32), b.reshape(1, D).astype(jnp.float32))
    return out.reshape(B, S, D)


def _attn_kernel(q_ref, k_ref, v_ref, km_ref, o_ref, *, scale, causal, H, Dh, tq):
    q = q_ref[0]            # (tq, D)  bf16
    k = k_ref[0]            # (Sk, D)  bf16
    v = v_ref[0]            # (Sk, D)  bf16
    Sk = k.shape[0]

    # Additive mask built in-kernel from the (1, Sk) key mask (+ causal iota).
    keym = km_ref[0] > 0                                      # (1, Sk)
    mask = jnp.broadcast_to(keym, (tq, Sk))
    if causal:
        q0 = pl.program_id(1) * tq
        qi = jax.lax.broadcasted_iota(jnp.int32, (tq, Sk), 0) + q0
        ki = jax.lax.broadcasted_iota(jnp.int32, (tq, Sk), 1)
        mask = mask & (ki <= qi)

    outs = []
    for h in range(H):                      # all heads in one program
        lo, hi = h * Dh, (h + 1) * Dh
        qh, kh, vh = q[:, lo:hi], k[:, lo:hi], v[:, lo:hi]
        # QK^T without an explicit transpose: contract the last dims directly.
        s = jax.lax.dot_general(
            qh, kh, (((1,), (1,)), ((), ())),
            preferred_element_type=jnp.float32) * scale        # (tq, Sk) f32
        s = jnp.where(mask, s, NEG_INF)
        s = s - jnp.max(s, axis=-1, keepdims=True)
        p = jnp.exp(s)
        p = p * pl.reciprocal(jnp.sum(p, axis=-1, keepdims=True), approx=True)
        outs.append(jax.lax.dot_general(
            p.astype(vh.dtype), vh, (((1,), (0,)), ((), ())),
            preferred_element_type=jnp.float32))

    o = outs[0] if H == 1 else jnp.concatenate(outs, axis=-1)  # (tq, D)
    o_ref[0] = o.astype(o_ref.dtype)                           # lane-dense store


def attention(q_slab, kv_slab, key_mask, *, causal, H, D, q_col, k_col, v_col):
    """Multi-head attention reading Q/K/V directly out of packed linear outputs.

    q_slab:  (B, Sq, Wq)  with the query columns at block `q_col` (width D).
    kv_slab: (B, Sk, Wkv) with key/value columns at blocks `k_col`/`v_col`.
    key_mask: (B, Sk) int, 1 = keep.  Output: (B, Sq, D) bf16.
    """
    B, Sq, Wq = q_slab.shape
    Sk = kv_slab.shape[1]
    Dh = D // H
    scale = 1.0 / (Dh ** 0.5)
    tq = _pick_tile(Sq, 256, 16)

    q_slab = q_slab.astype(jnp.bfloat16)
    kv_slab = kv_slab.astype(jnp.bfloat16)

    if D % 128 != 0:
        # Fallback: block width D would violate the lane-tiling rule unless it
        # equals the full last dim, so split the slabs with XLA slices first.
        if Wq != D:
            q_slab = jax.lax.slice_in_dim(q_slab, q_col * D, (q_col + 1) * D, axis=2)
            q_col = 0
        k_arr = jax.lax.slice_in_dim(kv_slab, k_col * D, (k_col + 1) * D, axis=2)
        v_arr = jax.lax.slice_in_dim(kv_slab, v_col * D, (v_col + 1) * D, axis=2)
        k_col, v_col = 0, 0
    else:
        k_arr = kv_slab
        v_arr = kv_slab

    km = key_mask.astype(jnp.int32).reshape(B, 1, Sk)
    kernel = functools.partial(_attn_kernel, scale=scale, causal=causal,
                               H=H, Dh=Dh, tq=tq)
    return pl.pallas_call(
        kernel,
        out_shape=jax.ShapeDtypeStruct((B, Sq, D), jnp.bfloat16),
        grid=(B, Sq // tq),
        in_specs=[
            pl.BlockSpec((1, tq, D), lambda b, qi: (b, qi, q_col)),
            pl.BlockSpec((1, Sk, D), lambda b, qi: (b, 0, k_col)),
            pl.BlockSpec((1, Sk, D), lambda b, qi: (b, 0, v_col)),
            pl.BlockSpec((1, 1, Sk), lambda b, qi: (b, 0, 0)),
        ],
        out_specs=pl.BlockSpec((1, tq, D), lambda b, qi: (b, qi, 0)),
        compiler_params=pltpu.CompilerParams(
            dimension_semantics=("parallel", "parallel")),
    )(q_slab, k_arr, v_arr, km)


# ----------------------------- model layers -----------------------------

def self_attention_layer(x, residual, p, key_mask, H, causal):
    """residual + attn_out_proj(attention(x)); residual add fused into the projection."""
    B, S, D = x.shape
    qkv = linear(x.reshape(B * S, D), p["w_qkv"], p["b_qkv"]).reshape(B, S, 3 * D)
    o = attention(qkv, qkv, key_mask, causal=causal, H=H, D=D,
                  q_col=0, k_col=1, v_col=2)                       # (B,S,D) bf16
    return linear(o.reshape(B * S, D), p["w_o"], p["b_o"],
                  residual=residual.reshape(B * S, D)).reshape(B, S, D)


def cross_attention_layer(x, residual, enc, p, enc_key_mask, H):
    B, Sq, D = x.shape
    Sk = enc.shape[1]
    q = linear(x.reshape(B * Sq, D), p["w_q"], p["b_q"]).reshape(B, Sq, D)
    kv = linear(enc.reshape(B * Sk, D), p["w_kv"], p["b_kv"]).reshape(B, Sk, 2 * D)
    o = attention(q, kv, enc_key_mask, causal=False, H=H, D=D,
                  q_col=0, k_col=0, v_col=1)
    return linear(o.reshape(B * Sq, D), p["w_o"], p["b_o"],
                  residual=residual.reshape(B * Sq, D)).reshape(B, Sq, D)


def mlp_layer(x, residual, p):
    """residual + W2(gelu(W1 x + b1)) + b2; gelu and residual fused into the matmuls."""
    B, S, D = x.shape
    h = linear(x.reshape(B * S, D), p["w1"], p["b1"], activation="gelu")
    return linear(h, p["w2"], p["b2"],
                  residual=residual.reshape(B * S, D)).reshape(B, S, D)


def encoder_forward(p, input_ids, attention_mask, H):
    B, S = input_ids.shape
    h = p["wte"][input_ids] + p["wpe"][:S][None]
    blk = p["block"]
    h = self_attention_layer(layernorm(h, blk["ln1_g"], blk["ln1_b"]), h,
                             blk["attn"], attention_mask, H, causal=False)
    h = mlp_layer(layernorm(h, blk["ln2_g"], blk["ln2_b"]), h, blk["mlp"])
    h = layernorm(h, p["lnf_g"], p["lnf_b"])
    return h


def decoder_forward(p, input_ids, attention_mask, enc_hidden, enc_attention_mask,
                    language_ids, H):
    B, S = input_ids.shape
    h = p["wte"][input_ids] + p["wpe"][:S][None] + p["wle"][language_ids][:, None, :]
    blk = p["block"]
    h = self_attention_layer(layernorm(h, blk["ln1_g"], blk["ln1_b"]), h,
                             blk["attn"], attention_mask, H, causal=True)
    h = cross_attention_layer(layernorm(h, blk["ln_x_g"], blk["ln_x_b"]), h,
                              enc_hidden, blk["xattn"], enc_attention_mask, H)
    h = mlp_layer(layernorm(h, blk["ln2_g"], blk["ln2_b"]), h, blk["mlp"])
    h = layernorm(h, p["lnf_g"], p["lnf_b"], out_dtype=jnp.float32)
    return h


def encoder_decoder_forward(params, config, input_ids=None, attention_mask=None,
                            decoder_input_ids=None, decoder_attention_mask=None,
                            decoder_language_ids=None):
    if config["ignore_encoder"]:
        encoder_last_layer = jnp.zeros(input_ids.shape + (config["n_embd"],),
                                       dtype=jnp.float32)
    else:
        encoder_last_layer = encoder_forward(params["encoder"], input_ids,
                                             attention_mask, config["n_head"])
    decoder_last_layer = decoder_forward(params["decoder"], decoder_input_ids,
                                         decoder_attention_mask, encoder_last_layer,
                                         attention_mask, decoder_language_ids,
                                         config["n_head"])
    # TODO(synk): self.expose(...) only stashes intermediates for inspection; no compute.
    return decoder_last_layer


# ----------------------------- param init -----------------------------

def _keygen(seed):
    key = jax.random.PRNGKey(seed)
    while True:
        key, sub = jax.random.split(key)
        yield sub


def _w(kg, shape, scale=0.02):
    return (scale * jax.random.normal(next(kg), shape)).astype(jnp.float32)


def init_params(seed, vocab, n_lang, max_pos, D, mlp_ratio=4):
    kg = _keygen(seed)
    Dm = mlp_ratio * D

    def attn_params():
        return dict(w_qkv=_w(kg, (D, 3 * D)), b_qkv=jnp.zeros((3 * D,), jnp.float32),
                    w_o=_w(kg, (D, D)), b_o=jnp.zeros((D,), jnp.float32))

    def xattn_params():
        return dict(w_q=_w(kg, (D, D)), b_q=jnp.zeros((D,), jnp.float32),
                    w_kv=_w(kg, (D, 2 * D)), b_kv=jnp.zeros((2 * D,), jnp.float32),
                    w_o=_w(kg, (D, D)), b_o=jnp.zeros((D,), jnp.float32))

    def mlp_params():
        return dict(w1=_w(kg, (D, Dm)), b1=jnp.zeros((Dm,), jnp.float32),
                    w2=_w(kg, (Dm, D)), b2=jnp.zeros((D,), jnp.float32))

    ones = lambda: jnp.ones((D,), jnp.float32)
    zeros = lambda: jnp.zeros((D,), jnp.float32)

    encoder = dict(
        wte=_w(kg, (vocab, D)), wpe=_w(kg, (max_pos, D)),
        block=dict(ln1_g=ones(), ln1_b=zeros(), attn=attn_params(),
                   ln2_g=ones(), ln2_b=zeros(), mlp=mlp_params()),
        lnf_g=ones(), lnf_b=zeros())

    decoder = dict(
        wte=_w(kg, (vocab, D)), wpe=_w(kg, (max_pos, D)), wle=_w(kg, (n_lang, D)),
        block=dict(ln1_g=ones(), ln1_b=zeros(), attn=attn_params(),
                   ln_x_g=ones(), ln_x_b=zeros(), xattn=xattn_params(),
                   ln2_g=ones(), ln2_b=zeros(), mlp=mlp_params()),
        lnf_g=ones(), lnf_b=zeros())

    return dict(encoder=encoder, decoder=decoder)


# ----------------------------- main -----------------------------

if __name__ == "__main__":
    # Small but lane-friendly test shapes: D multiple of 128 keeps the packed
    # Q/K/V column-block indexing and lane-dense attention stores exact.
    B, S_ENC, S_DEC, D, H = 2, 8, 8, 128, 2
    VOCAB, N_LANG, MAX_POS = 50, 3, 16

    config = dict(ignore_encoder=False, n_embd=D, n_head=H)
    params = init_params(0, VOCAB, N_LANG, MAX_POS, D)

    key = jax.random.PRNGKey(0)
    k1, k2, k3 = jax.random.split(key, 3)
    input_ids = jax.random.randint(k1, (B, S_ENC), 0, VOCAB)
    decoder_input_ids = jax.random.randint(k2, (B, S_DEC), 0, VOCAB)
    decoder_language_ids = jax.random.randint(k3, (B,), 0, N_LANG)
    attention_mask = jnp.ones((B, S_ENC), jnp.int32).at[1, -2:].set(0)
    decoder_attention_mask = jnp.ones((B, S_DEC), jnp.int32).at[0, -1:].set(0)

    out = encoder_decoder_forward(
        params, config,
        input_ids=input_ids, attention_mask=attention_mask,
        decoder_input_ids=decoder_input_ids,
        decoder_attention_mask=decoder_attention_mask,
        decoder_language_ids=decoder_language_ids)
    out = jax.block_until_ready(out)

    assert out.shape == (B, S_DEC, D), out.shape
    assert bool(jnp.all(jnp.isfinite(out)))
    print("KERNEL_OK")
</pallas_src>

<mosaic_0001>
module attributes {stable_mosaic.version = 11 : i64} {
  func.func @_ln_kernel(%arg0: i32, %arg1: memref<16x128xbf16, #tpu.memory_space<vmem>>, %arg2: memref<1x128xf32, #tpu.memory_space<vmem>>, %arg3: memref<1x128xf32, #tpu.memory_space<vmem>>, %arg4: memref<16x128xbf16, #tpu.memory_space<vmem>>) attributes {dimension_semantics = [#tpu.dimension_semantics<parallel>], iteration_bounds = array<i64: 1>, scalar_prefetch = 0 : i64, scratch_operands = 0 : i64, tpu.core_type = #tpu.core_type<tc>, window_params = [{transform_indices = @transform_0, window_bounds = array<i64: 16, 128>}, {pipeline_mode = #tpu.pipeline_mode<synchronous>, transform_indices = @transform_1, window_bounds = array<i64: 1, 128>}, {pipeline_mode = #tpu.pipeline_mode<synchronous>, transform_indices = @transform_2, window_bounds = array<i64: 1, 128>}, {transform_indices = @transform_3, window_bounds = array<i64: 16, 128>}]} {
    %c0 = arith.constant 0 : index
    %c0_0 = arith.constant 0 : index
    %0 = vector.load %arg1[%c0, %c0_0] : memref<16x128xbf16, #tpu.memory_space<vmem>>, vector<16x128xbf16>
    %1 = arith.extf %0 : vector<16x128xbf16> to vector<16x128xf32>
    %cst = arith.constant dense<0.000000e+00> : vector<16xf32>
    %2 = vector.multi_reduction <add>, %1, %cst [1] : vector<16x128xf32> to vector<16xf32>
    %3 = vector.shape_cast %2 : vector<16xf32> to vector<16x1xf32>
    %cst_1 = arith.constant 1.280000e+02 : f32
    %4 = vector.broadcast %cst_1 : f32 to vector<16x1xf32>
    %5 = arith.divf %3, %4 : vector<16x1xf32>
    %6 = vector.broadcast %5 : vector<16x1xf32> to vector<16x128xf32>
    %7 = arith.subf %1, %6 : vector<16x128xf32>
    %8 = arith.mulf %7, %7 : vector<16x128xf32>
    %cst_2 = arith.constant dense<0.000000e+00> : vector<16xf32>
    %9 = vector.multi_reduction <add>, %8, %cst_2 [1] : vector<16x128xf32> to vector<16xf32>
    %10 = vector.shape_cast %9 : vector<16xf32> to vector<16x1xf32>
    %cst_3 = arith.constant 1.280000e+02 : f32
    %11 = vector.broadcast %cst_3 : f32 to vector<16x1xf32>
    %12 = arith.divf %10, %11 : vector<16x1xf32>
    %13 = vector.broadcast %5 : vector<16x1xf32> to vector<16x128xf32>
    %14 = arith.subf %1, %13 : vector<16x128xf32>
    %cst_4 = arith.constant 9.99999974E-6 : f32
    %15 = vector.broadcast %cst_4 : f32 to vector<16x1xf32>
    %16 = arith.addf %12, %15 : vector<16x1xf32>
    %17 = math.rsqrt %16 : vector<16x1xf32>
    %18 = vector.broadcast %17 : vector<16x1xf32> to vector<16x128xf32>
    %19 = arith.mulf %14, %18 : vector<16x128xf32>
    %c0_5 = arith.constant 0 : index
    %c0_6 = arith.constant 0 : index
    %20 = vector.load %arg2[%c0_5, %c0_6] : memref<1x128xf32, #tpu.memory_space<vmem>>, vector<1x128xf32>
    %21 = vector.broadcast %20 : vector<1x128xf32> to vector<16x128xf32>
    %22 = arith.mulf %19, %21 : vector<16x128xf32>
    %c0_7 = arith.constant 0 : index
    %c0_8 = arith.constant 0 : index
    %23 = vector.load %arg3[%c0_7, %c0_8] : memref<1x128xf32, #tpu.memory_space<vmem>>, vector<1x128xf32>
    %24 = vector.broadcast %23 : vector<1x128xf32> to vector<16x128xf32>
    %25 = arith.addf %22, %24 : vector<16x128xf32>
    %26 = arith.truncf %25 : vector<16x128xf32> to vector<16x128xbf16>
    %c0_9 = arith.constant 0 : index
    %c0_10 = arith.constant 0 : index
    %27 = vector.load %arg4[%c0_9, %c0_10] : memref<16x128xbf16, #tpu.memory_space<vmem>>, vector<16x128xbf16>
    tpu.vector_store %arg4[%c0_9, %c0_10], %26 {strides = array<i32>} : memref<16x128xbf16, #tpu.memory_space<vmem>>, vector<16x128xbf16>,
    return
  }
  func.func @transform_0(%arg0: i32) -> (i32, i32) {
    %c0_i32 = arith.constant 0 : i32
    %c0_i32_0 = arith.constant 0 : i32
    return %arg0, %c0_i32 : i32, i32
  }
  func.func @transform_1(%arg0: i32) -> (i32, i32) {
    %c0_i32 = arith.constant 0 : i32
    %c0_i32_0 = arith.constant 0 : i32
    %c0_i32_1 = arith.constant 0 : i32
    return %c0_i32, %c0_i32_0 : i32, i32
  }
  func.func @transform_2(%arg0: i32) -> (i32, i32) {
    %c0_i32 = arith.constant 0 : i32
    %c0_i32_0 = arith.constant 0 : i32
    %c0_i32_1 = arith.constant 0 : i32
    return %c0_i32, %c0_i32_0 : i32, i32
  }
  func.func @transform_3(%arg0: i32) -> (i32, i32) {
    %c0_i32 = arith.constant 0 : i32
    %c0_i32_0 = arith.constant 0 : i32
    return %arg0, %c0_i32 : i32, i32
  }
}

</mosaic_0001>

<bundles_post_ra>
// kernel: tpu_custom_call.1
= control target key start
LH: loop header
LB: loop body
LE: loop exit
PB: predicated region body
PF: predicated region fallthrough
CT: control target
= control target key end

     0   :  { %8 = vsyncpa [#allocation3], 0  ;;  %s232_s0 = inlined_call_operand.hbm [shape: bf16[16,128], index: 0, kind: input, shape index: {}]   ;;  %s233_s1 = inlined_call_operand.vmem [shape: f32[1,128], index: 1, kind: input, shape index: {}]   ;;  %s234_s2 = inlined_call_operand.vmem [shape: f32[1,128], index: 2, kind: input, shape index: {}]   ;;  %s235_s3 = inlined_call_operand.hbm [shape: bf16[16,128], index: 3, kind: output, shape index: {}]  }
   0x1   :  { %9 = vsyncpa [#allocation4], 0  ;;  %s172_s12 = smov [#allocation2]   ;;  %s124_s16 = scalar_lea.hbm %s232_s0, 128 }
   0x2   :  { %s15_s13 = sshll.u32 %s172_s12, 4  ;;  %p125_p0 = scmp.ne.s32.totalorder %s232_s0, %s124_s16  ;;  %s16_s13 = int_to_ptr.vmem [resolvable:$true] %s15_s13 }
   0x3   :  { %p128_p1 = scmp.lt.u32.totalorder %s124_s16, %s232_s0 }
   0x5   :  { %p130_p2 = pnand %p128_p1, %p125_p0 }
   0x7   :  { %133 = shalt.err (!%p130_p2)
}
   0x8   :  { %s134_s21 = scalar_lea.vmem %s16_s13, 128  ;;  %p139_p4 = scmp.lt.s32.totalorder %s16_s13, %s16_s13 }
   0x9   :  { %p135_p3 = scmp.ne.s32.totalorder %s16_s13, %s134_s21  ;;  %p140_p5 = scmp.lt.s32.totalorder %s134_s21, %s134_s21 }
   0xb   :  { %p141_p6 = por %p140_p5, %p139_p4 }
   0xd   :  { %p142_p7 = pnand %p141_p6, %p135_p3 }
   0xf   :  { %145 = shalt.err (!%p142_p7)
}
  0x10   :  { %s173_s22 = smov 64   ;;  %s174_s23 = smov 4  }
  0x11   :  { %21 = dma.hbm_to_vmem [thread:$0]  %s232_s0, 128, %s16_s13, [#allocation3], %s173_s22, %s173_s22, %s174_s23  }
  0x12   :  { %168 = dma.done.wait [#allocation3], 128  }
  0x13   :  { %169 = vsyncadd [#allocation3], 4294967168  ;;  %v108_v0 = vld [vmem:[#allocation2] sm:$0xff]   ;;  %s175_s29 = smov [#allocation5]  }
  0x14   :  { %v109_v1 = vunpack.c.l.bf16 %v108_v0  ;;  %v110_v2 = vunpack.c.h.bf16 %v108_v0  ;;  %v101_v19 = vld [vmem:[%s233_s1] ss:$0 sm:$0xff]  ;;  %s89_s30 = sshll.u32 %s175_s29, 4  ;;  %s90_s30 = int_to_ptr.vmem [resolvable:$true] %s89_s30 }
  0x15   :  { %v102_v23 = vld [vmem:[%s234_s2] ss:$0 sm:$0xff]  ;;  %s146_s4 = scalar_lea.vmem %s90_s30, 128  ;;  %p151_p9 = scmp.lt.s32.totalorder %s90_s30, %s90_s30 }
  0x16   :  { %33 = vadd.xlane.f32.xlu0 %v109_v1  ;;  %p147_p8 = scmp.ne.s32.totalorder %s90_s30, %s146_s4  ;;  %p152_p10 = scmp.lt.s32.totalorder %s146_s4, %s146_s4 }
  0x18   :  { %p153_p11 = por %p152_p10, %p151_p9 }
  0x1a   :  { %35 = vadd.xlane.f32.xlu0 %v110_v2  ;;  %p154_p12 = pnand %p153_p11, %p147_p8 }
  0xa3   :  { %v34_v3 = vpop.xlane.xlu0 %33 }
  0xa4   :  { %v38_v4 = vmul.f32 0.0078125, %v34_v3 }
  0xa6   :  { %v40_v5 = vsub.f32 %v109_v1, %v38_v4 }
  0xa7   :  { %v36_v6 = vpop.xlane.xlu0 %35 }
  0xa8   :  { %v39_v7 = vmul.f32 0.0078125, %v36_v6  ;;  %v42_v8 = vmul.f32 %v40_v5, %v40_v5 }
  0xaa   :  { %v41_v9 = vsub.f32 %v110_v2, %v39_v7  ;;  %44 = vadd.xlane.f32.xlu1 %v42_v8 }
  0xac   :  { %v43_v10 = vmul.f32 %v41_v9, %v41_v9 }
  0xae   :  { %46 = vadd.xlane.f32.xlu1 %v43_v10 }
 0x137   :  { %v45_v11 = vpop.xlane.xlu1 %44 }
 0x138   :  { %v48_v12 = vmul.f32 0.0078125, %v45_v11 }
 0x13a   :  { %v50_v13 = vadd.f32 1e-05, %v48_v12 }
 0x13b   :  { %v47_v14 = vpop.xlane.xlu1 %46 }
 0x13c   :  { %120 = vrsqrt.f32 %v50_v13  ;;  %v49_v15 = vmul.f32 0.0078125, %v47_v14 }
 0x13e   :  { %v51_v16 = vadd.f32 1e-05, %v49_v15 }
 0x140   :  { %122 = vrsqrt.f32 %v51_v16 }
 0x146   :  { %v121_v17 = vpop.eup %120 }
 0x147   :  { %v54_v18 = vmul.f32 %v121_v17, %v40_v5 }
 0x149   :  { %v63_v22 = vmul.f32 %v101_v19, %v54_v18 }
 0x14a   :  { %v123_v20 = vpop.eup %122 }
 0x14b   :  { %v55_v21 = vmul.f32 %v123_v20, %v41_v9  ;;  %v72_v25 = vadd.f32 %v102_v23, %v63_v22 }
 0x14d   :  { %v64_v24 = vmul.f32 %v101_v19, %v55_v21 }
 0x14f   :  { %v73_v26 = vadd.f32 %v102_v23, %v64_v24 }
 0x151   :  { %v114_v27 = vpack.c.bf16 %v73_v26, %v72_v25 }
 0x153   :  { %115 = vst [vmem:[#allocation5] sm:$0xff] %v114_v27  }
 0x154   :  { %157 = shalt.err (!%p154_p12)
}
 0x155   :  { %s158_s6 = scalar_lea.hbm %s235_s3, 128 }
 0x156   :  { %p159_p13 = scmp.ne.s32.totalorder %s235_s3, %s158_s6  ;;  %p162_p0 = scmp.lt.u32.totalorder %s158_s6, %s235_s3 }
 0x158   :  { %p164_p1 = pnand %p162_p0, %p159_p13 }
 0x15a   :  { %167 = shalt.err (!%p164_p1)
}
 0x15b   :  { %95 = dma.vmem_to_hbm [thread:$0]  %s90_s30, 128, %s235_s3, [#allocation4], %s173_s22, %s173_s22, %s174_s23  }
 0x15c   :  { %170 = dma.done.wait [#allocation4], 128  }
 0x15d   :  { %171 = vsyncadd [#allocation4], 4294967168 }
 0x15e   :  { %99 = vsyncpa [#allocation3], 1 }
 0x15f   :  { %100 = vsyncpa [#allocation4], 1 }

</bundles_post_ra>
